<compile_context>
chip_gen: v7x
topology: tpu7x:2x2x1
jax: 0.10.0
libtpu: 0.0.40
codegen_flags: <defaults>
</compile_context>

<pallas_src>
import math

import jax
import jax.numpy as jnp
from jax.experimental import pallas as pl
from jax.experimental.pallas import tpu as pltpu


CATEGORICAL_DIM = 10
# Kept for API fidelity; the eps-free log-softmax rewrite differs from the reference
# by O(eps / (p*K)) per element — negligible for the loss value.
EPS = 1e-10


def _round_up(x, m):
    return ((x + m - 1) // m) * m


def _make_kernel(categorical_dim):
    # Plain Python scalars only (jnp constants would become captured consts -> error).
    k_dim = int(categorical_dim)
    log_k = float(math.log(categorical_dim))

    def kernel(x_ref, out_ref):
        # x_ref : (K, N, TB) logits block, batch on the 128-lane axis.
        # out_ref: (1, 1, TB) f32 — per-batch-element sum over (N, K).

        # Unrolled max over K: K-1 full-vreg VPU maxes, no XLU cross-lane reduce.
        m = x_ref[0].astype(jnp.float32)
        for k in range(1, k_dim):
            m = jnp.maximum(m, x_ref[k].astype(jnp.float32))

        z = jnp.zeros_like(m)   # sum_k exp(x_k - m)
        s = jnp.zeros_like(m)   # sum_k exp(x_k - m) * (x_k - m)
        for k in range(k_dim):
            xm = x_ref[k].astype(jnp.float32) - m
            e = jnp.exp(xm)                     # only per-element transcendental
            z = z + e
            s = s + e * xm

        # sum_k p_k * log(p_k*K) == s/z + logK - logZ   (since sum_k p_k == 1).
        # Exact divide/log: they run once per (n, b) row (K x fewer than the exps),
        # so the extra precision over pl.reciprocal(approx=True) is essentially free.
        row = s / z + (log_k - jnp.log(z))      # (N, TB)
        out_ref[...] = jnp.sum(row, axis=0, keepdims=True)[None]   # (1, 1, TB)

    return kernel


def _choose_block_b(batch, n, k, itemsize):
    """Batch tile (lane axis): multiple of 128, ~1 MiB block, >=2 grid steps if possible."""
    b128 = _round_up(max(batch, 1), 128)
    per_col = k * _round_up(max(n, 1), 8) * itemsize   # sublane-padded bytes / batch column
    budget = 1 << 20                                   # ~1 MiB per (double-buffered) block:
    tb = max(128, min(2048, (budget // per_col) // 128 * 128))  # portable v5e/v6e/v7x
    if b128 >= 256:
        # Leave at least two grid steps so v7x's second TensorCore gets work.
        tb = min(tb, _round_up(-(-b128 // 2), 128))
    return min(tb, b128)


def vae_gumbel_kl_loss(logits, categorical_dim=None, eps=EPS, block_b=None):
    """logits: (B, N, K) float array -> scalar float32 KL loss (mean over batch)."""
    B, N, K = logits.shape
    if categorical_dim is None:
        categorical_dim = K
    del eps  # folded analytically into the log-softmax rewrite (O(eps) difference)

    itemsize = jnp.dtype(logits.dtype).itemsize
    if block_b is None:
        block_b = _choose_block_b(B, N, K, itemsize)
    num_blocks = pl.cdiv(B, block_b)
    b_pad = num_blocks * block_b

    # Lane-dense layout: (B, N, K) -> (K, N, B_pad).  One extra XLA pass over HBM,
    # but it puts the large batch axis on the 128 lanes and K on the untiled axis.
    # TODO(synk): have the producer emit (K, N, B) directly to skip this transpose.
    x = jnp.transpose(logits, (2, 1, 0))
    if b_pad != B:
        # Zero-padded columns are sliced off below — cheaper than an in-kernel mask.
        x = jnp.pad(x, ((0, 0), (0, 0), (0, b_pad - B)))

    kernel = _make_kernel(categorical_dim)

    per_example = pl.pallas_call(
        kernel,
        out_shape=jax.ShapeDtypeStruct((num_blocks, 1, block_b), jnp.float32),
        grid_spec=pltpu.PrefetchScalarGridSpec(
            num_scalar_prefetch=0,
            grid=(num_blocks,),
            in_specs=[pl.BlockSpec((K, N, block_b), lambda i: (0, 0, i))],
            out_specs=pl.BlockSpec((1, 1, block_b), lambda i: (i, 0, 0)),
        ),
        compiler_params=pltpu.CompilerParams(
            # Each grid step writes its own output block -> no cross-step state,
            # safe to shard across TensorCores (v7x megacore).
            dimension_semantics=("parallel",),
        ),
    )(x)

    # One value per batch element; drop the zero-padded columns, then mean over B.
    vals = per_example.reshape(-1)[:B]
    return jnp.sum(vals) / jnp.float32(B)


def _reference(logits, categorical_dim=CATEGORICAL_DIM, eps=EPS):
    p = jax.nn.softmax(logits.astype(jnp.float32), axis=-1)
    p = p.reshape(logits.shape[0], -1)
    log_ratio = jnp.log(p * categorical_dim + eps)
    return jnp.mean(jnp.sum(p * log_ratio, axis=-1))


if __name__ == "__main__":
    key = jax.random.PRNGKey(0)
    B, N, K = 2, 8, CATEGORICAL_DIM          # (batch, latent vars, categories)
    logits = jax.random.normal(key, (B, N, K), dtype=jnp.float32)

    kld = jax.block_until_ready(vae_gumbel_kl_loss(logits))
    ref = jax.block_until_ready(_reference(logits))

    # Exact per-row divide/log keep the kernel within a few ulps of the reference;
    # the only intentional difference is the eps-free log-softmax rewrite (O(eps)).
    assert jnp.allclose(kld, ref, rtol=1e-3, atol=1e-5), (kld, ref)

    print("KERNEL_OK")
</pallas_src>

<mosaic_0001>
module attributes {stable_mosaic.version = 11 : i64} {
  func.func @kernel(%arg0: i32, %arg1: memref<10x8x128xf32, #tpu.memory_space<vmem>>, %arg2: memref<1x1x128xf32, #tpu.memory_space<vmem>>) attributes {dimension_semantics = [#tpu.dimension_semantics<parallel>], iteration_bounds = array<i64: 1>, scalar_prefetch = 0 : i64, scratch_operands = 0 : i64, tpu.core_type = #tpu.core_type<tc>, window_params = [{transform_indices = @transform_0, window_bounds = array<i64: 10, 8, 128>}, {transform_indices = @transform_1, window_bounds = array<i64: 1, 1, 128>}]} {
    %c0 = arith.constant 0 : index
    %c0_0 = arith.constant 0 : index
    %c0_1 = arith.constant 0 : index
    %0 = vector.load %arg1[%c0, %c0_0, %c0_1] : memref<10x8x128xf32, #tpu.memory_space<vmem>>, vector<1x8x128xf32>
    %1 = vector.shape_cast %0 : vector<1x8x128xf32> to vector<8x128xf32>
    %c1 = arith.constant 1 : index
    %c0_2 = arith.constant 0 : index
    %c0_3 = arith.constant 0 : index
    %2 = vector.load %arg1[%c1, %c0_2, %c0_3] : memref<10x8x128xf32, #tpu.memory_space<vmem>>, vector<1x8x128xf32>
    %3 = vector.shape_cast %2 : vector<1x8x128xf32> to vector<8x128xf32>
    %4 = arith.maximumf %1, %3 : vector<8x128xf32>
    %c2 = arith.constant 2 : index
    %c0_4 = arith.constant 0 : index
    %c0_5 = arith.constant 0 : index
    %5 = vector.load %arg1[%c2, %c0_4, %c0_5] : memref<10x8x128xf32, #tpu.memory_space<vmem>>, vector<1x8x128xf32>
    %6 = vector.shape_cast %5 : vector<1x8x128xf32> to vector<8x128xf32>
    %7 = arith.maximumf %4, %6 : vector<8x128xf32>
    %c3 = arith.constant 3 : index
    %c0_6 = arith.constant 0 : index
    %c0_7 = arith.constant 0 : index
    %8 = vector.load %arg1[%c3, %c0_6, %c0_7] : memref<10x8x128xf32, #tpu.memory_space<vmem>>, vector<1x8x128xf32>
    %9 = vector.shape_cast %8 : vector<1x8x128xf32> to vector<8x128xf32>
    %10 = arith.maximumf %7, %9 : vector<8x128xf32>
    %c4 = arith.constant 4 : index
    %c0_8 = arith.constant 0 : index
    %c0_9 = arith.constant 0 : index
    %11 = vector.load %arg1[%c4, %c0_8, %c0_9] : memref<10x8x128xf32, #tpu.memory_space<vmem>>, vector<1x8x128xf32>
    %12 = vector.shape_cast %11 : vector<1x8x128xf32> to vector<8x128xf32>
    %13 = arith.maximumf %10, %12 : vector<8x128xf32>
    %c5 = arith.constant 5 : index
    %c0_10 = arith.constant 0 : index
    %c0_11 = arith.constant 0 : index
    %14 = vector.load %arg1[%c5, %c0_10, %c0_11] : memref<10x8x128xf32, #tpu.memory_space<vmem>>, vector<1x8x128xf32>
    %15 = vector.shape_cast %14 : vector<1x8x128xf32> to vector<8x128xf32>
    %16 = arith.maximumf %13, %15 : vector<8x128xf32>
    %c6 = arith.constant 6 : index
    %c0_12 = arith.constant 0 : index
    %c0_13 = arith.constant 0 : index
    %17 = vector.load %arg1[%c6, %c0_12, %c0_13] : memref<10x8x128xf32, #tpu.memory_space<vmem>>, vector<1x8x128xf32>
    %18 = vector.shape_cast %17 : vector<1x8x128xf32> to vector<8x128xf32>
    %19 = arith.maximumf %16, %18 : vector<8x128xf32>
    %c7 = arith.constant 7 : index
    %c0_14 = arith.constant 0 : index
    %c0_15 = arith.constant 0 : index
    %20 = vector.load %arg1[%c7, %c0_14, %c0_15] : memref<10x8x128xf32, #tpu.memory_space<vmem>>, vector<1x8x128xf32>
    %21 = vector.shape_cast %20 : vector<1x8x128xf32> to vector<8x128xf32>
    %22 = arith.maximumf %19, %21 : vector<8x128xf32>
    %c8 = arith.constant 8 : index
    %c0_16 = arith.constant 0 : index
    %c0_17 = arith.constant 0 : index
    %23 = vector.load %arg1[%c8, %c0_16, %c0_17] : memref<10x8x128xf32, #tpu.memory_space<vmem>>, vector<1x8x128xf32>
    %24 = vector.shape_cast %23 : vector<1x8x128xf32> to vector<8x128xf32>
    %25 = arith.maximumf %22, %24 : vector<8x128xf32>
    %c9 = arith.constant 9 : index
    %c0_18 = arith.constant 0 : index
    %c0_19 = arith.constant 0 : index
    %26 = vector.load %arg1[%c9, %c0_18, %c0_19] : memref<10x8x128xf32, #tpu.memory_space<vmem>>, vector<1x8x128xf32>
    %27 = vector.shape_cast %26 : vector<1x8x128xf32> to vector<8x128xf32>
    %28 = arith.maximumf %25, %27 : vector<8x128xf32>
    %cst = arith.constant 0.000000e+00 : f32
    %29 = vector.broadcast %cst : f32 to vector<8x128xf32>
    %cst_20 = arith.constant 0.000000e+00 : f32
    %30 = vector.broadcast %cst_20 : f32 to vector<8x128xf32>
    %c0_21 = arith.constant 0 : index
    %c0_22 = arith.constant 0 : index
    %c0_23 = arith.constant 0 : index
    %31 = vector.load %arg1[%c0_21, %c0_22, %c0_23] : memref<10x8x128xf32, #tpu.memory_space<vmem>>, vector<1x8x128xf32>
    %32 = vector.shape_cast %31 : vector<1x8x128xf32> to vector<8x128xf32>
    %33 = arith.subf %32, %28 : vector<8x128xf32>
    %34 = math.exp %33 : vector<8x128xf32>
    %35 = arith.addf %29, %34 : vector<8x128xf32>
    %36 = arith.mulf %34, %33 : vector<8x128xf32>
    %37 = arith.addf %30, %36 : vector<8x128xf32>
    %c1_24 = arith.constant 1 : index
    %c0_25 = arith.constant 0 : index
    %c0_26 = arith.constant 0 : index
    %38 = vector.load %arg1[%c1_24, %c0_25, %c0_26] : memref<10x8x128xf32, #tpu.memory_space<vmem>>, vector<1x8x128xf32>
    %39 = vector.shape_cast %38 : vector<1x8x128xf32> to vector<8x128xf32>
    %40 = arith.subf %39, %28 : vector<8x128xf32>
    %41 = math.exp %40 : vector<8x128xf32>
    %42 = arith.addf %35, %41 : vector<8x128xf32>
    %43 = arith.mulf %41, %40 : vector<8x128xf32>
    %44 = arith.addf %37, %43 : vector<8x128xf32>
    %c2_27 = arith.constant 2 : index
    %c0_28 = arith.constant 0 : index
    %c0_29 = arith.constant 0 : index
    %45 = vector.load %arg1[%c2_27, %c0_28, %c0_29] : memref<10x8x128xf32, #tpu.memory_space<vmem>>, vector<1x8x128xf32>
    %46 = vector.shape_cast %45 : vector<1x8x128xf32> to vector<8x128xf32>
    %47 = arith.subf %46, %28 : vector<8x128xf32>
    %48 = math.exp %47 : vector<8x128xf32>
    %49 = arith.addf %42, %48 : vector<8x128xf32>
    %50 = arith.mulf %48, %47 : vector<8x128xf32>
    %51 = arith.addf %44, %50 : vector<8x128xf32>
    %c3_30 = arith.constant 3 : index
    %c0_31 = arith.constant 0 : index
    %c0_32 = arith.constant 0 : index
    %52 = vector.load %arg1[%c3_30, %c0_31, %c0_32] : memref<10x8x128xf32, #tpu.memory_space<vmem>>, vector<1x8x128xf32>
    %53 = vector.shape_cast %52 : vector<1x8x128xf32> to vector<8x128xf32>
    %54 = arith.subf %53, %28 : vector<8x128xf32>
    %55 = math.exp %54 : vector<8x128xf32>
    %56 = arith.addf %49, %55 : vector<8x128xf32>
    %57 = arith.mulf %55, %54 : vector<8x128xf32>
    %58 = arith.addf %51, %57 : vector<8x128xf32>
    %c4_33 = arith.constant 4 : index
    %c0_34 = arith.constant 0 : index
    %c0_35 = arith.constant 0 : index
    %59 = vector.load %arg1[%c4_33, %c0_34, %c0_35] : memref<10x8x128xf32, #tpu.memory_space<vmem>>, vector<1x8x128xf32>
    %60 = vector.shape_cast %59 : vector<1x8x128xf32> to vector<8x128xf32>
    %61 = arith.subf %60, %28 : vector<8x128xf32>
    %62 = math.exp %61 : vector<8x128xf32>
    %63 = arith.addf %56, %62 : vector<8x128xf32>
    %64 = arith.mulf %62, %61 : vector<8x128xf32>
    %65 = arith.addf %58, %64 : vector<8x128xf32>
    %c5_36 = arith.constant 5 : index
    %c0_37 = arith.constant 0 : index
    %c0_38 = arith.constant 0 : index
    %66 = vector.load %arg1[%c5_36, %c0_37, %c0_38] : memref<10x8x128xf32, #tpu.memory_space<vmem>>, vector<1x8x128xf32>
    %67 = vector.shape_cast %66 : vector<1x8x128xf32> to vector<8x128xf32>
    %68 = arith.subf %67, %28 : vector<8x128xf32>
    %69 = math.exp %68 : vector<8x128xf32>
    %70 = arith.addf %63, %69 : vector<8x128xf32>
    %71 = arith.mulf %69, %68 : vector<8x128xf32>
    %72 = arith.addf %65, %71 : vector<8x128xf32>
    %c6_39 = arith.constant 6 : index
    %c0_40 = arith.constant 0 : index
    %c0_41 = arith.constant 0 : index
    %73 = vector.load %arg1[%c6_39, %c0_40, %c0_41] : memref<10x8x128xf32, #tpu.memory_space<vmem>>, vector<1x8x128xf32>
    %74 = vector.shape_cast %73 : vector<1x8x128xf32> to vector<8x128xf32>
    %75 = arith.subf %74, %28 : vector<8x128xf32>
    %76 = math.exp %75 : vector<8x128xf32>
    %77 = arith.addf %70, %76 : vector<8x128xf32>
    %78 = arith.mulf %76, %75 : vector<8x128xf32>
    %79 = arith.addf %72, %78 : vector<8x128xf32>
    %c7_42 = arith.constant 7 : index
    %c0_43 = arith.constant 0 : index
    %c0_44 = arith.constant 0 : index
    %80 = vector.load %arg1[%c7_42, %c0_43, %c0_44] : memref<10x8x128xf32, #tpu.memory_space<vmem>>, vector<1x8x128xf32>
    %81 = vector.shape_cast %80 : vector<1x8x128xf32> to vector<8x128xf32>
    %82 = arith.subf %81, %28 : vector<8x128xf32>
    %83 = math.exp %82 : vector<8x128xf32>
    %84 = arith.addf %77, %83 : vector<8x128xf32>
    %85 = arith.mulf %83, %82 : vector<8x128xf32>
    %86 = arith.addf %79, %85 : vector<8x128xf32>
    %c8_45 = arith.constant 8 : index
    %c0_46 = arith.constant 0 : index
    %c0_47 = arith.constant 0 : index
    %87 = vector.load %arg1[%c8_45, %c0_46, %c0_47] : memref<10x8x128xf32, #tpu.memory_space<vmem>>, vector<1x8x128xf32>
    %88 = vector.shape_cast %87 : vector<1x8x128xf32> to vector<8x128xf32>
    %89 = arith.subf %88, %28 : vector<8x128xf32>
    %90 = math.exp %89 : vector<8x128xf32>
    %91 = arith.addf %84, %90 : vector<8x128xf32>
    %92 = arith.mulf %90, %89 : vector<8x128xf32>
    %93 = arith.addf %86, %92 : vector<8x128xf32>
    %c9_48 = arith.constant 9 : index
    %c0_49 = arith.constant 0 : index
    %c0_50 = arith.constant 0 : index
    %94 = vector.load %arg1[%c9_48, %c0_49, %c0_50] : memref<10x8x128xf32, #tpu.memory_space<vmem>>, vector<1x8x128xf32>
    %95 = vector.shape_cast %94 : vector<1x8x128xf32> to vector<8x128xf32>
    %96 = arith.subf %95, %28 : vector<8x128xf32>
    %97 = math.exp %96 : vector<8x128xf32>
    %98 = arith.addf %91, %97 : vector<8x128xf32>
    %99 = arith.mulf %97, %96 : vector<8x128xf32>
    %100 = arith.addf %93, %99 : vector<8x128xf32>
    %101 = arith.divf %100, %98 : vector<8x128xf32>
    %102 = math.log %98 : vector<8x128xf32>
    %cst_51 = arith.constant 2.30258512 : f32
    %103 = vector.broadcast %cst_51 : f32 to vector<8x128xf32>
    %104 = arith.subf %103, %102 : vector<8x128xf32>
    %105 = arith.addf %101, %104 : vector<8x128xf32>
    %cst_52 = arith.constant dense<0.000000e+00> : vector<128xf32>
    %106 = vector.multi_reduction <add>, %105, %cst_52 [0] : vector<8x128xf32> to vector<128xf32>
    %107 = vector.shape_cast %106 : vector<128xf32> to vector<1x128xf32>
    %108 = vector.shape_cast %107 : vector<1x128xf32> to vector<1x1x128xf32>
    %c0_53 = arith.constant 0 : index
    %c0_54 = arith.constant 0 : index
    %c0_55 = arith.constant 0 : index
    %109 = vector.load %arg2[%c0_53, %c0_54, %c0_55] : memref<1x1x128xf32, #tpu.memory_space<vmem>>, vector<1x1x128xf32>
    tpu.vector_store %arg2[%c0_53, %c0_54, %c0_55], %108 {strides = array<i32>} : memref<1x1x128xf32, #tpu.memory_space<vmem>>, vector<1x1x128xf32>,
    return
  }
  func.func @transform_0(%arg0: i32) -> (i32, i32, i32) {
    %c0_i32 = arith.constant 0 : i32
    %c0_i32_0 = arith.constant 0 : i32
    %c0_i32_1 = arith.constant 0 : i32
    return %c0_i32, %c0_i32_0, %arg0 : i32, i32, i32
  }
  func.func @transform_1(%arg0: i32) -> (i32, i32, i32) {
    %c0_i32 = arith.constant 0 : i32
    %c0_i32_0 = arith.constant 0 : i32
    %c0_i32_1 = arith.constant 0 : i32
    return %arg0, %c0_i32, %c0_i32_0 : i32, i32, i32
  }
}

</mosaic_0001>

<bundles_post_ra>
// kernel: tpu_custom_call.1
= control target key start
LH: loop header
LB: loop body
LE: loop exit
PB: predicated region body
PF: predicated region fallthrough
CT: control target
= control target key end

     0   :  { %6 = vsyncpa [#allocation3], 0  ;;  %s253_s0 = inlined_call_operand.hbm [shape: f32[10,8,128], index: 0, kind: input, shape index: {}]   ;;  %s254_s1 = inlined_call_operand.hbm [shape: f32[1,1,128], index: 1, kind: output, shape index: {}]  }
   0x1   :  { %7 = vsyncpa [#allocation4], 0  ;;  %s215_s6 = smov [#allocation2]   ;;  %s167_s10 = scalar_lea.hbm %s253_s0, 1280 }
   0x2   :  { %s13_s7 = sshll.u32 %s215_s6, 4  ;;  %p168_p0 = scmp.ne.s32.totalorder %s253_s0, %s167_s10  ;;  %s14_s7 = int_to_ptr.vmem [resolvable:$true] %s13_s7 }
   0x3   :  { %p171_p1 = scmp.lt.u32.totalorder %s167_s10, %s253_s0 }
   0x5   :  { %p173_p2 = pnand %p171_p1, %p168_p0 }
   0x7   :  { %176 = shalt.err (!%p173_p2)
}
   0x8   :  { %s177_s15 = scalar_lea.vmem %s14_s7, 1280  ;;  %p182_p4 = scmp.lt.s32.totalorder %s14_s7, %s14_s7 }
   0x9   :  { %p178_p3 = scmp.ne.s32.totalorder %s14_s7, %s177_s15  ;;  %p183_p5 = scmp.lt.s32.totalorder %s177_s15, %s177_s15 }
   0xb   :  { %p184_p6 = por %p183_p5, %p182_p4 }
   0xd   :  { %p185_p7 = pnand %p184_p6, %p178_p3 }
   0xf   :  { %188 = shalt.err (!%p185_p7)
}
  0x10   :  { %s216_s16 = smov 128   ;;  %s217_s17 = smov 8  }
  0x11   :  { %19 = dma.hbm_to_vmem [thread:$0]  %s253_s0, 1280, %s14_s7, [#allocation3], %s216_s16, %s216_s16, %s217_s17  }
  0x12   :  { %211 = dma.done.wait [#allocation3], 1280  }
  0x13   :  { %212 = vsyncadd [#allocation3], 4294966016  ;;  %v23_v0 = vld [vmem:[#allocation2] sm:$0xff]  ;;  %v25_v1 = vld [vmem:[#allocation2 + $0x8] sm:$0xff]  ;;  %s218_s0 = smov [#allocation5]  }
  0x14   :  { %v28_v2 = vld [vmem:[#allocation2 + $0x10] sm:$0xff]  ;;  %v26_v3 = vmax.f32 %v23_v0, %v25_v1  ;;  %v31_v4 = vld [vmem:[#allocation2 + $0x18] sm:$0xff]  ;;  %v34_v6 = vld [vmem:[#allocation2 + $0x20] sm:$0xff]  ;;  %s130_s20 = sshll.u32 %s218_s0, 4  ;;  %s131_s20 = int_to_ptr.vmem [resolvable:$true] %s130_s20 }
  0x15   :  { %v37_v8 = vld [vmem:[#allocation2 + $0x28] sm:$0xff]  ;;  %v40_v10 = vld [vmem:[#allocation2 + $0x30] sm:$0xff]  ;;  %v43_v12 = vld [vmem:[#allocation2 + $0x38] sm:$0xff]  ;;  %s189_s21 = scalar_lea.vmem %s131_s20, 16  ;;  %s193_s22 = scalar_lea.vmem %s131_s20, 32 }
  0x16   :  { %v29_v5 = vmax.f32 %v26_v3, %v28_v2  ;;  %v46_v14 = vld [vmem:[#allocation2 + $0x40] sm:$0xff]  ;;  %v49_v16 = vld [vmem:[#allocation2 + $0x48] sm:$0xff]  ;;  %p190_p8 = scmp.ne.s32.totalorder %s131_s20, %s189_s21  ;;  %p194_p9 = scmp.lt.s32.totalorder %s131_s20, %s131_s20 }
  0x17   :  { %p195_p10 = scmp.lt.s32.totalorder %s193_s22, %s189_s21 }
  0x18   :  { %v32_v7 = vmax.f32 %v29_v5, %v31_v4 }
  0x19   :  { %p196_p11 = por %p195_p10, %p194_p9 }
  0x1a   :  { %v35_v9 = vmax.f32 %v32_v7, %v34_v6 }
  0x1b   :  { %p197_p12 = pnand %p196_p11, %p190_p8 }
  0x1c   :  { %v38_v11 = vmax.f32 %v35_v9, %v37_v8 }
  0x1e   :  { %v41_v13 = vmax.f32 %v38_v11, %v40_v10 }
  0x20   :  { %v44_v15 = vmax.f32 %v41_v13, %v43_v12 }
  0x22   :  { %v47_v17 = vmax.f32 %v44_v15, %v46_v14 }
  0x24   :  { %v50_v18 = vmax.f32 %v47_v17, %v49_v16 }
  0x26   :  { %v51_v19 = vsub.f32 %v23_v0, %v50_v18  ;;  %v57_v20 = vsub.f32 %v25_v1, %v50_v18  ;;  %v63_v21 = vsub.f32 %v28_v2, %v50_v18  ;;  %v69_v22 = vsub.f32 %v31_v4, %v50_v18 }
  0x27   :  { %v75_v23 = vsub.f32 %v34_v6, %v50_v18  ;;  %v81_v28 = vsub.f32 %v37_v8, %v50_v18  ;;  %v87_v30 = vsub.f32 %v40_v10, %v50_v18  ;;  %v93_v32 = vsub.f32 %v43_v12, %v50_v18 }
  0x28   :  { %v52_v24 = vmul.f32 1.442695, %v51_v19  ;;  %v58_v25 = vmul.f32 1.442695, %v57_v20  ;;  %v64_v26 = vmul.f32 1.442695, %v63_v21  ;;  %v99_v34 = vsub.f32 %v46_v14, %v50_v18 }
  0x29   :  { %v70_v27 = vmul.f32 1.442695, %v69_v22  ;;  %v76_v29 = vmul.f32 1.442695, %v75_v23  ;;  %v82_v31 = vmul.f32 1.442695, %v81_v28  ;;  %v105_v36 = vsub.f32 %v49_v16, %v50_v18 }
  0x2a   :  { %143 = vpow2.f32 %v52_v24  ;;  %v88_v33 = vmul.f32 1.442695, %v87_v30  ;;  %v94_v35 = vmul.f32 1.442695, %v93_v32  ;;  %v100_v37 = vmul.f32 1.442695, %v99_v34 }
  0x2b   :  { %145 = vpow2.f32 %v58_v25  ;;  %v106_v41 = vmul.f32 1.442695, %v105_v36 }
  0x2c   :  { %147 = vpow2.f32 %v64_v26 }
  0x2d   :  { %149 = vpow2.f32 %v70_v27 }
  0x2e   :  { %151 = vpow2.f32 %v76_v29 }
  0x2f   :  { %153 = vpow2.f32 %v82_v31 }
  0x30   :  { %155 = vpow2.f32 %v88_v33 }
  0x31   :  { %157 = vpow2.f32 %v94_v35 }
  0x32   :  { %159 = vpow2.f32 %v100_v37 }
  0x33   :  { %161 = vpow2.f32 %v106_v41 }
  0x34   :  { %v144_v38 = vpop.eup %143 }
  0x35   :  { %v146_v39 = vpop.eup %145  ;;  %v55_v40 = vmul.f32 %v144_v38, %v51_v19 }
  0x36   :  { %v148_v42 = vpop.eup %147  ;;  %v60_v43 = vadd.f32 %v146_v39, %v144_v38  ;;  %v61_v44 = vmul.f32 %v146_v39, %v57_v20 }
  0x37   :  { %v150_v45 = vpop.eup %149  ;;  %v67_v46 = vmul.f32 %v148_v42, %v63_v21 }
  0x38   :  { %v62_v47 = vadd.f32 %v61_v44, %v55_v40  ;;  %v66_v48 = vadd.f32 %v148_v42, %v60_v43  ;;  %v73_v49 = vmul.f32 %v150_v45, %v69_v22  ;;  %v152_v50 = vpop.eup %151 }
  0x39   :  { %v79_v53 = vmul.f32 %v152_v50, %v75_v23  ;;  %v154_v54 = vpop.eup %153 }
  0x3a   :  { %v68_v51 = vadd.f32 %v67_v46, %v62_v47  ;;  %v72_v52 = vadd.f32 %v150_v45, %v66_v48  ;;  %v85_v57 = vmul.f32 %v154_v54, %v81_v28  ;;  %v156_v58 = vpop.eup %155 }
  0x3b   :  { %v158_v61 = vpop.eup %157  ;;  %v91_v0 = vmul.f32 %v156_v58, %v87_v30 }
  0x3c   :  { %v74_v55 = vadd.f32 %v73_v49, %v68_v51  ;;  %v78_v56 = vadd.f32 %v152_v50, %v72_v52  ;;  %v160_v1 = vpop.eup %159  ;;  %v97_v5 = vmul.f32 %v158_v61, %v93_v32 }
  0x3d   :  { %v162_v3 = vpop.eup %161  ;;  %v103_v9 = vmul.f32 %v160_v1, %v99_v34 }
  0x3e   :  { %v80_v59 = vadd.f32 %v79_v53, %v74_v55  ;;  %v84_v60 = vadd.f32 %v154_v54, %v78_v56  ;;  %v109_v11 = vmul.f32 %v162_v3, %v105_v36 }
  0x40   :  { %v86_v62 = vadd.f32 %v85_v57, %v80_v59  ;;  %v90_v63 = vadd.f32 %v156_v58, %v84_v60 }
  0x42   :  { %v96_v2 = vadd.f32 %v158_v61, %v90_v63  ;;  %v92_v4 = vadd.f32 %v91_v0, %v86_v62 }
  0x44   :  { %v102_v6 = vadd.f32 %v160_v1, %v96_v2  ;;  %v98_v8 = vadd.f32 %v97_v5, %v92_v4 }
  0x46   :  { %v108_v7 = vadd.f32 %v162_v3, %v102_v6  ;;  %v104_v10 = vadd.f32 %v103_v9, %v98_v8 }
  0x48   :  { %163 = vrcp.f32 %v108_v7  ;;  %v110_v12 = vadd.f32 %v109_v11, %v104_v10 }
  0x49   :  { %165 = vlog2.f32 %v108_v7 }
  0x52   :  { %v164_v13 = vpop.eup %163 }
  0x53   :  { %v166_v14 = vpop.eup %165  ;;  %v112_v15 = vmul.f32 %v164_v13, %v110_v12 }
  0x54   :  { %v114_v16 = vmul.f32 0.6931472, %v166_v14 }
  0x56   :  { %v115_v17 = vsub.f32 2.3025851, %v114_v16 }
  0x58   :  { %v116_v18 = vadd.f32 %v115_v17, %v112_v15 }
  0x5a   :  { %v117_v19 = vrot.slane %v116_v18, 4 }
  0x5c   :  { %v118_v20 = vadd.f32 %v117_v19, %v116_v18 }
  0x5e   :  { %v119_v21 = vrot.slane %v118_v20, 2 }
  0x60   :  { %v120_v22 = vadd.f32 %v119_v21, %v118_v20 }
  0x62   :  { %v121_v23 = vrot.slane %v120_v22, 1 }
  0x64   :  { %v122_v24 = vadd.f32 %v121_v23, %v120_v22 }
  0x66   :  { %123 = vst [vmem:[#allocation5] sm:$0x1] %v122_v24 }
  0x67   :  { %200 = shalt.err (!%p197_p12)
}
  0x68   :  { %s201_s25 = scalar_lea.hbm %s254_s1, 16 }
  0x69   :  { %p202_p13 = scmp.ne.s32.totalorder %s254_s1, %s201_s25  ;;  %p205_p0 = scmp.lt.u32.totalorder %s201_s25, %s254_s1 }
  0x6b   :  { %p207_p1 = pnand %p205_p0, %p202_p13 }
  0x6d   :  { %210 = shalt.err (!%p207_p1)
}
  0x6e   :  { %133 = dma.vmem_to_hbm [thread:$0]  %s131_s20, 16, %s254_s1, [#allocation4]  }
  0x6f   :  { %213 = dma.done.wait [#allocation4], 16  }
  0x70   :  { %214 = vsyncadd [#allocation4], 4294967280 }
  0x71   :  { %137 = vsyncpa [#allocation3], 1 }
  0x72   :  { %138 = vsyncpa [#allocation4], 1 }

</bundles_post_ra>
